<compile_context>
chip_gen: v6e
topology: v6e:2x2x1
jax: 0.10.0
libtpu: 0.0.40
codegen_flags: <defaults>
</compile_context>

<pallas_src>
import jax
import jax.numpy as jnp
from jax.experimental import pallas as pl
from jax.experimental.pallas import tpu as pltpu


_MASK_BIAS = -1e30  # finite "minus infinity" for additive masking


def _make_kernel(H, D, masked):
    """Build an attention kernel body with heads packed along lanes.

    Kernel refs:
      q_ref : (tq, H*D)   native dtype
      k_ref : (S,  H*D)
      v_ref : (S,  H*D)
      kvb   : (1, S) f32 additive key/value mask bias (masked variant only)
      o_ref : (tq, H*D)
    """

    def body(q_ref, k_ref, v_ref, *rest):
        if masked:
            kvb_ref, o_ref = rest
            kvb = kvb_ref[...]                      # (1, S) f32
        else:
            (o_ref,) = rest
            kvb = None

        q = q_ref[...]                              # (tq, H*D)
        k = k_ref[...]                              # (S,  H*D)
        v = v_ref[...]                              # (S,  H*D)

        # Fold 1/sqrt(D) into q: tq*D multiplies instead of tq*S on scores.
        scale = jnp.asarray(1.0 / (D ** 0.5), dtype=q.dtype)

        outs = []
        for h in range(H):                          # static loop, small H
            lo = h * D
            q_h = q[:, lo:lo + D] * scale           # (tq, D)
            k_h = k[:, lo:lo + D]                   # (S,  D)
            v_h = v[:, lo:lo + D]                   # (S,  D)

            # (tq, D) x (S, D) -> (tq, S); f32 accumulation on the MXU.
            s = jax.lax.dot_general(
                q_h, k_h, dimension_numbers=(((1,), (1,)), ((), ())),
                preferred_element_type=jnp.float32)

            if kvb is not None:
                s = s + kvb                         # broadcast (1, S) -> (tq, S)

            # Numerically stable softmax over S, kept in f32.
            m = jnp.max(s, axis=-1, keepdims=True)
            p = jnp.exp(s - m)
            denom = jnp.sum(p, axis=-1, keepdims=True)

            # Un-normalized P @ V, then one per-row reciprocal multiply (EUP).
            acc = jax.lax.dot_general(
                p.astype(v_h.dtype), v_h,
                dimension_numbers=(((1,), (0,)), ((), ())),
                preferred_element_type=jnp.float32)  # (tq, D)
            outs.append(acc * pl.reciprocal(denom, approx=True))

        # Single lane-dense (tq, H*D) store.
        o_ref[...] = jnp.concatenate(outs, axis=-1).astype(o_ref.dtype)

    return body


def full_attention(queries, keys, values, q_mask=None, kv_mask=None, *,
                   block_q=512):
    """Pallas implementation of FullAttention.forward (dropout disabled).

    queries: [N, L, H, D], keys/values: [N, S, H, D]
    q_mask: [N, L] bool (optional), kv_mask: [N, S] bool (optional)
    returns: [N, L, H, D]
    """
    # TODO(synk): attention dropout (use_dropout=True path) not implemented;
    # the reference module defaults to use_dropout=False.
    # TODO(synk): fully masked query rows yield a kv-masked softmax instead of
    # PyTorch's NaN; a per-row constant bias is a no-op under softmax so the
    # q_mask bias stream is dropped entirely.
    N, L, H, D = queries.shape
    S = keys.shape[1]
    HD = H * D

    # Free reshapes only — heads stay packed along the lane dim (no HBM
    # transposes for q/k/v or the output).
    q = queries.reshape(N, L, HD)
    k = keys.reshape(N, S, HD)
    v = values.reshape(N, S, HD)

    itemsize = jnp.dtype(queries.dtype).itemsize

    def vmem_est(tq):
        q_o = 2 * 2 * tq * HD * itemsize            # q + o, double-buffered
        kv = 2 * 2 * S * HD * itemsize              # k + v, double-buffered
        bias = 2 * S * 4                            # kv bias (double-buffered)
        scratch = 6 * tq * S * 4 + 4 * tq * HD * 4  # f32 score/prob/acc headroom
        return q_o + kv + bias + scratch

    # Shrink tq until the working set fits a generation-safe budget
    # (v7x has only 64 MiB physical / 32 MiB scoped-default VMEM).
    budget = 24 * 1024 * 1024
    tq = block_q
    while tq > 8 and vmem_est(tq) > budget:
        tq //= 2
    tq = min(tq, L)
    # TODO(synk): for very large S (>~2-4K) a kv-tile axis with online softmax
    # would be needed; CAT-Seg-sized S keeps K/V and the (tq, S) scores resident.

    grid = (N, pl.cdiv(L, tq))

    q_spec = pl.BlockSpec((None, tq, HD), lambda n, l: (n, l, 0))
    kv_spec = pl.BlockSpec((None, S, HD), lambda n, l: (n, 0, 0))
    o_spec = pl.BlockSpec((None, tq, HD), lambda n, l: (n, l, 0))
    out_shape = jax.ShapeDtypeStruct((N, L, HD), queries.dtype)

    vmem_limit = int(min(64 * 1024 * 1024,
                         max(32 * 1024 * 1024, vmem_est(tq) + (8 << 20))))
    compiler_params = pltpu.CompilerParams(
        # N is "parallel" (megacore shards batches); L tiles are "arbitrary"
        # so K/V reuse across L tiles is preserved on 2-TC chips.
        dimension_semantics=("parallel", "arbitrary"),
        vmem_limit_bytes=vmem_limit)

    if kv_mask is not None:
        # Tiny additive-bias vector [N, 1, S]; the dense (tq, S) bias is formed
        # by broadcast inside the kernel — never materialized in HBM.
        kv_bias = jnp.where(kv_mask, 0.0, _MASK_BIAS).astype(
            jnp.float32)[:, None, :]
        out = pl.pallas_call(
            _make_kernel(H, D, masked=True),
            out_shape=out_shape,
            grid_spec=pltpu.PrefetchScalarGridSpec(
                num_scalar_prefetch=0,
                grid=grid,
                in_specs=[
                    q_spec, kv_spec, kv_spec,
                    pl.BlockSpec((None, 1, S), lambda n, l: (n, 0, 0)),
                ],
                out_specs=o_spec),
            compiler_params=compiler_params,
        )(q, k, v, kv_bias)
    else:
        out = pl.pallas_call(
            _make_kernel(H, D, masked=False),
            out_shape=out_shape,
            grid_spec=pltpu.PrefetchScalarGridSpec(
                num_scalar_prefetch=0,
                grid=grid,
                in_specs=[q_spec, kv_spec, kv_spec],
                out_specs=o_spec),
            compiler_params=compiler_params,
        )(q, k, v)

    # Free reshape back to [N, L, H, D].
    return out.reshape(N, L, H, D)


def full_attention_ref(queries, keys, values, q_mask=None, kv_mask=None):
    """Pure-JAX reference mirroring the PyTorch module."""
    QK = jnp.einsum('nlhd,nshd->nlsh', queries, keys)
    if kv_mask is not None:
        m = q_mask[:, :, None, None] & kv_mask[:, None, :, None]
        QK = jnp.where(m, QK, -jnp.inf)
    temp = 1.0 / queries.shape[3] ** 0.5
    A = jax.nn.softmax(temp * QK, axis=2)
    return jnp.einsum('nlsh,nshd->nlhd', A, values)


if __name__ == "__main__":
    # Small shapes consistent with the module's [N, L, H, D] / [N, S, H, D] API.
    N, L, S, H, D = 2, 16, 8, 4, 32
    key = jax.random.PRNGKey(0)
    kq, kk, kv = jax.random.split(key, 3)
    queries = jax.random.normal(kq, (N, L, H, D), dtype=jnp.float32)
    keys = jax.random.normal(kk, (N, S, H, D), dtype=jnp.float32)
    values = jax.random.normal(kv, (N, S, H, D), dtype=jnp.float32)

    # Tolerance covers the approximate per-row reciprocal (EUP) and default
    # MXU matmul precision; indexing/masking bugs would be O(1) errors.
    TOL = 5e-3

    # 1) no-mask path (dedicated kernel variant, no bias streaming)
    out = jax.block_until_ready(full_attention(queries, keys, values))
    ref = full_attention_ref(queries, keys, values)
    assert out.shape == (N, L, H, D)
    assert jnp.allclose(out, ref, atol=TOL, rtol=TOL), "no-mask mismatch"

    # 2) masked path (every query row keeps at least one valid key)
    q_mask = jnp.ones((N, L), dtype=bool)
    kv_mask = (jnp.arange(S)[None, :] < jnp.array([[S], [S // 2]])).reshape(N, S)
    out_m = jax.block_until_ready(
        full_attention(queries, keys, values, q_mask, kv_mask))
    ref_m = full_attention_ref(queries, keys, values, q_mask, kv_mask)
    assert jnp.allclose(out_m, ref_m, atol=TOL, rtol=TOL), "masked mismatch"

    print("KERNEL_OK")
</pallas_src>

<mosaic_0001>
module attributes {stable_mosaic.version = 11 : i64} {
  func.func @body(%arg0: i32, %arg1: i32, %arg2: memref<1x16x128xf32, #tpu.memory_space<vmem>>, %arg3: memref<1x8x128xf32, #tpu.memory_space<vmem>>, %arg4: memref<1x8x128xf32, #tpu.memory_space<vmem>>, %arg5: memref<1x16x128xf32, #tpu.memory_space<vmem>>) attributes {dimension_semantics = [#tpu.dimension_semantics<parallel>, #tpu.dimension_semantics<arbitrary>], iteration_bounds = array<i64: 2, 1>, scalar_prefetch = 0 : i64, scratch_operands = 0 : i64, tpu.core_type = #tpu.core_type<tc>, window_params = [{transform_indices = @transform_0, window_bounds = array<i64: 1, 16, 128>}, {transform_indices = @transform_1, window_bounds = array<i64: 1, 8, 128>}, {transform_indices = @transform_2, window_bounds = array<i64: 1, 8, 128>}, {transform_indices = @transform_3, window_bounds = array<i64: 1, 16, 128>}]} {
    %c0 = arith.constant 0 : index
    %c0_0 = arith.constant 0 : index
    %c0_1 = arith.constant 0 : index
    %0 = vector.load %arg2[%c0, %c0_0, %c0_1] : memref<1x16x128xf32, #tpu.memory_space<vmem>>, vector<1x16x128xf32>
    %1 = vector.shape_cast %0 : vector<1x16x128xf32> to vector<16x128xf32>
    %c0_2 = arith.constant 0 : index
    %c0_3 = arith.constant 0 : index
    %c0_4 = arith.constant 0 : index
    %2 = vector.load %arg3[%c0_2, %c0_3, %c0_4] : memref<1x8x128xf32, #tpu.memory_space<vmem>>, vector<1x8x128xf32>
    %3 = vector.shape_cast %2 : vector<1x8x128xf32> to vector<8x128xf32>
    %c0_5 = arith.constant 0 : index
    %c0_6 = arith.constant 0 : index
    %c0_7 = arith.constant 0 : index
    %4 = vector.load %arg4[%c0_5, %c0_6, %c0_7] : memref<1x8x128xf32, #tpu.memory_space<vmem>>, vector<1x8x128xf32>
    %5 = vector.shape_cast %4 : vector<1x8x128xf32> to vector<8x128xf32>
    %6 = vector.extract_strided_slice %1 {offsets = [0, 0], sizes = [16, 32], strides = [1, 1]} : vector<16x128xf32> to vector<16x32xf32>
    %cst = arith.constant 0.176776692 : f32
    %7 = vector.broadcast %cst : f32 to vector<16x32xf32>
    %8 = arith.mulf %6, %7 : vector<16x32xf32>
    %9 = vector.extract_strided_slice %3 {offsets = [0, 0], sizes = [8, 32], strides = [1, 1]} : vector<8x128xf32> to vector<8x32xf32>
    %10 = vector.extract_strided_slice %5 {offsets = [0, 0], sizes = [8, 32], strides = [1, 1]} : vector<8x128xf32> to vector<8x32xf32>
    %cst_8 = arith.constant dense<0.000000e+00> : vector<16x8xf32>
    %11 = tpu.matmul %8, %9, %cst_8 {dimension_numbers = #tpu.dot_dimension_numbers<[1], [1], [0], [0], [0, 0, 1, 0], [], []>} : vector<16x32xf32>, vector<8x32xf32>, vector<16x8xf32> -> vector<16x8xf32>
    %cst_9 = arith.constant dense<0xFF800000> : vector<16xf32>
    %12 = vector.multi_reduction <maximumf>, %11, %cst_9 [1] : vector<16x8xf32> to vector<16xf32>
    %13 = vector.shape_cast %12 : vector<16xf32> to vector<16x1xf32>
    %14 = vector.broadcast %13 : vector<16x1xf32> to vector<16x8xf32>
    %15 = arith.subf %11, %14 : vector<16x8xf32>
    %16 = math.exp %15 : vector<16x8xf32>
    %cst_10 = arith.constant dense<0.000000e+00> : vector<16xf32>
    %17 = vector.multi_reduction <add>, %16, %cst_10 [1] : vector<16x8xf32> to vector<16xf32>
    %18 = vector.shape_cast %17 : vector<16xf32> to vector<16x1xf32>
    %cst_11 = arith.constant dense<0.000000e+00> : vector<16x32xf32>
    %19 = tpu.matmul %16, %10, %cst_11 {dimension_numbers = #tpu.dot_dimension_numbers<[1], [0], [0], [1], [0, 0, 1, 1], [], []>} : vector<16x8xf32>, vector<8x32xf32>, vector<16x32xf32> -> vector<16x32xf32>
    %20 = tpu.reciprocal %18 {approx = true} : vector<16x1xf32> -> vector<16x1xf32>
    %21 = vector.broadcast %20 : vector<16x1xf32> to vector<16x32xf32>
    %22 = arith.mulf %19, %21 : vector<16x32xf32>
    %23 = vector.extract_strided_slice %1 {offsets = [0, 32], sizes = [16, 32], strides = [1, 1]} : vector<16x128xf32> to vector<16x32xf32>
    %cst_12 = arith.constant 0.176776692 : f32
    %24 = vector.broadcast %cst_12 : f32 to vector<16x32xf32>
    %25 = arith.mulf %23, %24 : vector<16x32xf32>
    %26 = vector.extract_strided_slice %3 {offsets = [0, 32], sizes = [8, 32], strides = [1, 1]} : vector<8x128xf32> to vector<8x32xf32>
    %27 = vector.extract_strided_slice %5 {offsets = [0, 32], sizes = [8, 32], strides = [1, 1]} : vector<8x128xf32> to vector<8x32xf32>
    %cst_13 = arith.constant dense<0.000000e+00> : vector<16x8xf32>
    %28 = tpu.matmul %25, %26, %cst_13 {dimension_numbers = #tpu.dot_dimension_numbers<[1], [1], [0], [0], [0, 0, 1, 0], [], []>} : vector<16x32xf32>, vector<8x32xf32>, vector<16x8xf32> -> vector<16x8xf32>
    %cst_14 = arith.constant dense<0xFF800000> : vector<16xf32>
    %29 = vector.multi_reduction <maximumf>, %28, %cst_14 [1] : vector<16x8xf32> to vector<16xf32>
    %30 = vector.shape_cast %29 : vector<16xf32> to vector<16x1xf32>
    %31 = vector.broadcast %30 : vector<16x1xf32> to vector<16x8xf32>
    %32 = arith.subf %28, %31 : vector<16x8xf32>
    %33 = math.exp %32 : vector<16x8xf32>
    %cst_15 = arith.constant dense<0.000000e+00> : vector<16xf32>
    %34 = vector.multi_reduction <add>, %33, %cst_15 [1] : vector<16x8xf32> to vector<16xf32>
    %35 = vector.shape_cast %34 : vector<16xf32> to vector<16x1xf32>
    %cst_16 = arith.constant dense<0.000000e+00> : vector<16x32xf32>
    %36 = tpu.matmul %33, %27, %cst_16 {dimension_numbers = #tpu.dot_dimension_numbers<[1], [0], [0], [1], [0, 0, 1, 1], [], []>} : vector<16x8xf32>, vector<8x32xf32>, vector<16x32xf32> -> vector<16x32xf32>
    %37 = tpu.reciprocal %35 {approx = true} : vector<16x1xf32> -> vector<16x1xf32>
    %38 = vector.broadcast %37 : vector<16x1xf32> to vector<16x32xf32>
    %39 = arith.mulf %36, %38 : vector<16x32xf32>
    %40 = vector.extract_strided_slice %1 {offsets = [0, 64], sizes = [16, 32], strides = [1, 1]} : vector<16x128xf32> to vector<16x32xf32>
    %cst_17 = arith.constant 0.176776692 : f32
    %41 = vector.broadcast %cst_17 : f32 to vector<16x32xf32>
    %42 = arith.mulf %40, %41 : vector<16x32xf32>
    %43 = vector.extract_strided_slice %3 {offsets = [0, 64], sizes = [8, 32], strides = [1, 1]} : vector<8x128xf32> to vector<8x32xf32>
    %44 = vector.extract_strided_slice %5 {offsets = [0, 64], sizes = [8, 32], strides = [1, 1]} : vector<8x128xf32> to vector<8x32xf32>
    %cst_18 = arith.constant dense<0.000000e+00> : vector<16x8xf32>
    %45 = tpu.matmul %42, %43, %cst_18 {dimension_numbers = #tpu.dot_dimension_numbers<[1], [1], [0], [0], [0, 0, 1, 0], [], []>} : vector<16x32xf32>, vector<8x32xf32>, vector<16x8xf32> -> vector<16x8xf32>
    %cst_19 = arith.constant dense<0xFF800000> : vector<16xf32>
    %46 = vector.multi_reduction <maximumf>, %45, %cst_19 [1] : vector<16x8xf32> to vector<16xf32>
    %47 = vector.shape_cast %46 : vector<16xf32> to vector<16x1xf32>
    %48 = vector.broadcast %47 : vector<16x1xf32> to vector<16x8xf32>
    %49 = arith.subf %45, %48 : vector<16x8xf32>
    %50 = math.exp %49 : vector<16x8xf32>
    %cst_20 = arith.constant dense<0.000000e+00> : vector<16xf32>
    %51 = vector.multi_reduction <add>, %50, %cst_20 [1] : vector<16x8xf32> to vector<16xf32>
    %52 = vector.shape_cast %51 : vector<16xf32> to vector<16x1xf32>
    %cst_21 = arith.constant dense<0.000000e+00> : vector<16x32xf32>
    %53 = tpu.matmul %50, %44, %cst_21 {dimension_numbers = #tpu.dot_dimension_numbers<[1], [0], [0], [1], [0, 0, 1, 1], [], []>} : vector<16x8xf32>, vector<8x32xf32>, vector<16x32xf32> -> vector<16x32xf32>
    %54 = tpu.reciprocal %52 {approx = true} : vector<16x1xf32> -> vector<16x1xf32>
    %55 = vector.broadcast %54 : vector<16x1xf32> to vector<16x32xf32>
    %56 = arith.mulf %53, %55 : vector<16x32xf32>
    %57 = vector.extract_strided_slice %1 {offsets = [0, 96], sizes = [16, 32], strides = [1, 1]} : vector<16x128xf32> to vector<16x32xf32>
    %cst_22 = arith.constant 0.176776692 : f32
    %58 = vector.broadcast %cst_22 : f32 to vector<16x32xf32>
    %59 = arith.mulf %57, %58 : vector<16x32xf32>
    %60 = vector.extract_strided_slice %3 {offsets = [0, 96], sizes = [8, 32], strides = [1, 1]} : vector<8x128xf32> to vector<8x32xf32>
    %61 = vector.extract_strided_slice %5 {offsets = [0, 96], sizes = [8, 32], strides = [1, 1]} : vector<8x128xf32> to vector<8x32xf32>
    %cst_23 = arith.constant dense<0.000000e+00> : vector<16x8xf32>
    %62 = tpu.matmul %59, %60, %cst_23 {dimension_numbers = #tpu.dot_dimension_numbers<[1], [1], [0], [0], [0, 0, 1, 0], [], []>} : vector<16x32xf32>, vector<8x32xf32>, vector<16x8xf32> -> vector<16x8xf32>
    %cst_24 = arith.constant dense<0xFF800000> : vector<16xf32>
    %63 = vector.multi_reduction <maximumf>, %62, %cst_24 [1] : vector<16x8xf32> to vector<16xf32>
    %64 = vector.shape_cast %63 : vector<16xf32> to vector<16x1xf32>
    %65 = vector.broadcast %64 : vector<16x1xf32> to vector<16x8xf32>
    %66 = arith.subf %62, %65 : vector<16x8xf32>
    %67 = math.exp %66 : vector<16x8xf32>
    %cst_25 = arith.constant dense<0.000000e+00> : vector<16xf32>
    %68 = vector.multi_reduction <add>, %67, %cst_25 [1] : vector<16x8xf32> to vector<16xf32>
    %69 = vector.shape_cast %68 : vector<16xf32> to vector<16x1xf32>
    %cst_26 = arith.constant dense<0.000000e+00> : vector<16x32xf32>
    %70 = tpu.matmul %67, %61, %cst_26 {dimension_numbers = #tpu.dot_dimension_numbers<[1], [0], [0], [1], [0, 0, 1, 1], [], []>} : vector<16x8xf32>, vector<8x32xf32>, vector<16x32xf32> -> vector<16x32xf32>
    %71 = tpu.reciprocal %69 {approx = true} : vector<16x1xf32> -> vector<16x1xf32>
    %72 = vector.broadcast %71 : vector<16x1xf32> to vector<16x32xf32>
    %73 = arith.mulf %70, %72 : vector<16x32xf32>
    %74 = tpu.concatenate %22, %39, %56, %73 in 1 : vector<16x32xf32>, vector<16x32xf32>, vector<16x32xf32>, vector<16x32xf32> -> vector<16x128xf32>
    %c0_27 = arith.constant 0 : index
    %c0_28 = arith.constant 0 : index
    %c0_29 = arith.constant 0 : index
    %75 = vector.load %arg5[%c0_27, %c0_28, %c0_29] : memref<1x16x128xf32, #tpu.memory_space<vmem>>, vector<1x16x128xf32>
    %76 = vector.shape_cast %75 : vector<1x16x128xf32> to vector<16x128xf32>
    %77 = vector.shape_cast %74 : vector<16x128xf32> to vector<1x16x128xf32>
    tpu.vector_store %arg5[%c0_27, %c0_28, %c0_29], %77 {strides = array<i32>} : memref<1x16x128xf32, #tpu.memory_space<vmem>>, vector<1x16x128xf32>,
    return
  }
  func.func @transform_0(%arg0: i32, %arg1: i32) -> (i32, i32, i32) {
    %c0_i32 = arith.constant 0 : i32
    %c0_i32_0 = arith.constant 0 : i32
    return %arg0, %arg1, %c0_i32 : i32, i32, i32
  }
  func.func @transform_1(%arg0: i32, %arg1: i32) -> (i32, i32, i32) {
    %c0_i32 = arith.constant 0 : i32
    %c0_i32_0 = arith.constant 0 : i32
    %c0_i32_1 = arith.constant 0 : i32
    return %arg0, %c0_i32, %c0_i32_0 : i32, i32, i32
  }
  func.func @transform_2(%arg0: i32, %arg1: i32) -> (i32, i32, i32) {
    %c0_i32 = arith.constant 0 : i32
    %c0_i32_0 = arith.constant 0 : i32
    %c0_i32_1 = arith.constant 0 : i32
    return %arg0, %c0_i32, %c0_i32_0 : i32, i32, i32
  }
  func.func @transform_3(%arg0: i32, %arg1: i32) -> (i32, i32, i32) {
    %c0_i32 = arith.constant 0 : i32
    %c0_i32_0 = arith.constant 0 : i32
    return %arg0, %arg1, %c0_i32 : i32, i32, i32
  }
}

</mosaic_0001>

<bundles_post_ra>
// kernel: tpu_custom_call.1
= control target key start
LH: loop header
LB: loop body
LE: loop exit
PB: predicated region body
PF: predicated region fallthrough
CT: control target
= control target key end

     0   :  { %s1933_s0 = inlined_call_operand.hbm [shape: f32[2,16,128], index: 0, kind: input, shape index: {}]   ;;  %s1934_s1 = inlined_call_operand.hbm [shape: f32[2,8,128], index: 1, kind: input, shape index: {}]   ;;  %s1935_s2 = inlined_call_operand.hbm [shape: f32[2,8,128], index: 2, kind: input, shape index: {}]   ;;  %s1936_s3 = inlined_call_operand.hbm [shape: f32[2,16,128], index: 3, kind: output, shape index: {}]  }
   0x1   :  { %1938 = sst [smem:[#allocation12_spill]] %s1933_s0 }
   0x2   :  { %1939 = sst [smem:[#allocation13_spill]] %s1934_s1 }
   0x3   :  { %1940 = sst [smem:[#allocation14_spill]] %s1935_s2 }
   0x4   :  { %8 = vsyncpa [#allocation3], 0 }
   0x5   :  { %10 = vsyncpa [#allocation3 + $0x1], 0 }
   0x6   :  { %11 = vsyncpa [#allocation6], 0 }
   0x7   :  { %13 = vsyncpa [#allocation6 + $0x1], 0 }
   0x8   :  { %14 = vsyncpa [#allocation4], 0 }
   0x9   :  { %16 = vsyncpa [#allocation4 + $0x1], 0  ;;  %s1654_s12 = smov 0   ;;  %s1656_s13 = smov 0  }
   0xa   :  { %s1658_s14 = smov 0   ;;  %s1660_s15 = smov 0  }
   0xb   :  { %s1662_s16 = smov 0   ;;  %s1664_s17 = smov 0  }
   0xc LB: > { %s1685_s18 = sadd.s32 4294967295, %s1621_s17   ;;  %s1236_s19 = sadd.s32 4294967294, %s1621_s17   ;;  %s1621_s17 = sphi %s1664_s17, %s22_s17   ;;  %s1617_s16 = sphi %s1662_s16, %s1956_s16   ;;  %s1613_s15 = sphi %s1660_s15, %s1955_s15   ;;  %s1609_s14 = sphi %s1658_s14, %s1954_s14   ;;  %s1605_s13 = sphi %s1656_s13, %s1953_s13   ;;  %s1601_s12 = sphi %s1654_s12, %s1952_s12  }
   0xd   : > { %s34_s20 = sadd.s32 1, %s1617_s16  ;;  %s43_s21 = sadd.s32 1, %s1609_s14 }
   0xe   : > { %p36_p0 = scmp.ge.s32.totalorder %s34_s20, 2  ;;  %p50_p1 = scmp.ne.s32.totalorder %s1609_s14, %s1605_s13 }
   0xf   : > { %p51_p2 = scmp.eq.s32.totalorder %s1621_s17, 0  ;;  %p56_p3 = scmp.ne.s32.totalorder %s1605_s13, %s1601_s12 }
  0x10   : > { %s1958_s20 = smov (%p36_p0, %s34_s20), 0  ;;  %p57_p5 = scmp.eq.s32.totalorder %s1685_s18, 0 }
  0x11   : > { %p1697_p4 = por %p51_p2, %p50_p1  ;;  %s38_s23 = ssub.s32 %s1617_s16, %s1958_s20 }
  0x12   : > { %p134_p6 = scmp.eq.s32.totalorder %s1685_s18, 1  ;;  %p41_p7 = scmp.eq.s32.totalorder %s38_s23, 0 }
  0x13   : > { %p1705_p8 = por %p57_p5, %p56_p3  ;;  %p140_p10 = scmp.eq.s32.totalorder %s1236_s19, 1 }
  0x14   : > { %p1709_p9 = por %p134_p6, %p50_p1  ;;  %p1364_p13 = scmp.lt.s32.totalorder %s1621_s17, 2 }
  0x15   : > { %s1714_s26 = scalar_select %p41_p7, %s1609_s14, %s43_s21  }
  0x16   : > { %p1716_p11 = por %p140_p10, %p56_p3  ;;  %s1723_s28 = sand.u32 1, %s1609_s14  }
  0x17   : > { %s183_s29 = sand.u32 1, %s1621_s17   ;;  %s1937_s30 = sshll.u32 %s1723_s28, 3 }
  0x18   : > { %p1729_p0 = pnand %p1364_p13, %p1697_p4  ;;  %s1243_s5 = sshll.u32 %s1617_s16, 7 }
  0x19   : > { %s1946_s1 = sld [smem:[#allocation13_spill]]  ;;  %s187_s9 = scalar_lea.vmem [#allocation5], %s1937_s30 }
  0x1a   : > { %s194_s10 = sshll.u32 %s187_s9, 4  ;;  %s1947_s2 = sld [smem:[#allocation14_spill]]  ;;  %s195_s10 = int_to_ptr.vmem [resolvable:$true] %s194_s10 }
  0x1b   : > { %s1744_s22 = scalar_lea.sflag [#allocation6], %s183_s29  ;;  %p1455_p1 = pneg %p1729_p0 }
  0x1c   : > { %s1466_s23 = scalar_lea.vmem %s195_s10, 128  ;;  %s1623_s6 = smov [#allocation5]  }
  0x1d   : > { %p1467_p2 = scmp.ne.s32.totalorder %s195_s10, %s1466_s23  ;;  %s1471_s7 = sshll.u32 %s1623_s6, 4  ;;  %s1472_s7 = int_to_ptr.vmem [resolvable:$false] %s1471_s7 }
  0x1e   : > { %s1473_s9 = scalar_lea.vmem %s1472_s7, 256  ;;  %p1474_p5 = scmp.lt.s32.totalorder %s195_s10, %s1472_s7 }
  0x1f   : > { %s192_s8 = scalar_lea.hbm %s1946_s1, %s1243_s5  ;;  %p1469_p3 = pnand %p1467_p2, %p1455_p1 }
  0x20   : > { %s1742_s21 = scalar_lea.hbm %s1947_s2, %s1243_s5  ;;  %p1475_p6 = scmp.lt.s32.totalorder %s1473_s9, %s1466_s23 }
  0x21   : > { %p1470_p4 = pneg %p1469_p3 }
  0x22   : > { %p1476_p7 = por %p1475_p6, %p1474_p5 }
  0x24   : > { %p1477_p10 = pnand %p1476_p7, %p1470_p4 }
  0x26   : > { %1480 = shalt.err (!%p1477_p10)
}
  0x27   : > { %1356 = dma.hbm_to_vmem [thread:$0]  (!%p1729_p0), %s192_s8, 128, %s195_s10, %s1744_s22  }
  0x28   : > { %p1246_p13 = scmp.ge.s32.totalorder %s1621_s17, 1  ;;  %p217_p2 = scmp.lt.s32.totalorder %s1621_s17, 3 }
  0x29   : > { %s1239_s5 = sshll.u32 %s1723_s28, 4  ;;  %s1276_s11 = sshll.u32 %s1617_s16, 8 }
  0x2a   : > { %p1756_p3 = pnand %p1246_p13, %p217_p2  ;;  %s1949_s0 = sld [smem:[#allocation12_spill]] }
  0x2b   : > { %s164_s7 = scalar_lea.vmem [#allocation2], %s1239_s5  ;;  %s161_s30 = scalar_lea.sflag [#allocation3], %s1723_s28 }
  0x2c   : > { %s173_s9 = sshll.u32 %s164_s7, 4  ;;  %s1624_s8 = smov [#allocation2]   ;;  %s174_s9 = int_to_ptr.vmem [resolvable:$true] %s173_s9 }
  0x2d   : > { %s1494_s1 = scalar_lea.vmem %s174_s9, 256  ;;  %s1499_s10 = sshll.u32 %s1624_s8, 4  ;;  %s1500_s10 = int_to_ptr.vmem [resolvable:$false] %s1499_s10 }
  0x2e   : > { %p1495_p4 = scmp.ne.s32.totalorder %s174_s9, %s1494_s1  ;;  %s1501_s2 = scalar_lea.vmem %s1500_s10, 512 }
  0x2f   : > { %p1502_p7 = scmp.lt.s32.totalorder %s174_s9, %s1500_s10  ;;  %p1503_p10 = scmp.lt.s32.totalorder %s1501_s2, %s1494_s1 }
  0x30   : > { %s172_s6 = scalar_lea.hbm %s1949_s0, %s1276_s11  ;;  %p1497_p5 = pnand %p1495_p4, %p1455_p1 }
  0x31   : > { %p1504_p13 = por %p1503_p10, %p1502_p7 }
  0x32   : > { %p1498_p6 = pneg %p1497_p5 }
  0x34   : > { %p1505_p2 = pnand %p1504_p13, %p1498_p6 }
  0x36   : > { %1508 = shalt.err (!%p1505_p2)
}
  0x37   : > { %s1625_s11 = smov 128   ;;  %s1626_s5 = smov 8  }
  0x38   : > { %1353 = dma.hbm_to_vmem [thread:$0]  (!%p1729_p0), %s172_s6, 256, %s174_s9, %s161_s30, %s1625_s11, %s1625_s11, %s1626_s5  }
  0x39   : > { %s1950_s19 = sshll.u32 %s1723_s28, 3  ;;  %s1627_s1 = smov [#allocation7]  }
  0x3a   : > { %s205_s23 = scalar_lea.vmem [#allocation7], %s1950_s19  ;;  %s1527_s2 = sshll.u32 %s1627_s1, 4  ;;  %s1528_s2 = int_to_ptr.vmem [resolvable:$false] %s1527_s2 }
  0x3b   : > { %s212_s7 = sshll.u32 %s205_s23, 4  ;;  %s1529_s8 = scalar_lea.vmem %s1528_s2, 256  ;;  %s213_s7 = int_to_ptr.vmem [resolvable:$true] %s212_s7 }
  0x3c   : > { %s1522_s0 = scalar_lea.vmem %s213_s7, 128  ;;  %p1530_p6 = scmp.lt.s32.totalorder %s213_s7, %s1528_s2 }
  0x3d   : > { %p1523_p4 = scmp.ne.s32.totalorder %s213_s7, %s1522_s0  ;;  %p1531_p7 = scmp.lt.s32.totalorder %s1529_s8, %s1522_s0 }
  0x3f   : > { %p1525_p5 = pnand %p1523_p4, %p1455_p1  ;;  %p1532_p10 = por %p1531_p7, %p1530_p6 }
  0x41   : > { %p1526_p12 = pneg %p1525_p5 }
  0x43   : > { %p1533_p13 = pnand %p1532_p10, %p1526_p12 }
  0x45   : > { %1536 = shalt.err (!%p1533_p13)
}
  0x46   : > { %1359 = dma.hbm_to_vmem [thread:$0]  (!%p1729_p0), %s1742_s21, 128, %s213_s7, %s1744_s22  }
  0x47   : > { %221 = sbr.rel (%p1756_p3) target bundleno = 1138 (0x472), region = 32  ;;  %s1783_s28 = sand.u32 (!%p1756_p3), 1, %s1605_s13  }
  0x48   : > { %s1247_s30 = sshll.u32 (!%p1756_p3), %s1783_s28, 4  ;;  %s224_s0 = scalar_lea.sflag (!%p1756_p3), [#allocation3], %s1783_s28 }
  0x49   : > { %s227_s6 = scalar_lea.vmem (!%p1756_p3), [#allocation2], %s1247_s30 }
  0x4c   : > { %1588 = dma.done.wait (%p1705_p8), %s224_s0, 256  }
  0x4d   : > { %1590 = vsyncadd (%p1705_p8), %s224_s0, 4294967040  ;;  %s232_s4 = sand.u32 1, %s1685_s18   ;;  %s1248_s21 = sshll.u32 %s1783_s28, 3 }
  0x4e   : > { %s233_s22 = scalar_lea.sflag [#allocation6], %s232_s4  ;;  %s236_s29 = scalar_lea.vmem [#allocation5], %s1248_s21 }
  0x4f   : > { %1592 = dma.done.wait (%p1705_p8), %s233_s22, 256  }
  0x50   : > { %1594 = vsyncadd (%p1705_p8), %s233_s22, 4294967040  ;;  %vm286_vm0 = vcmask 261120   ;;  %v282_v0 = vld [vmem:[%s236_s29] sm:$0xff]  ;;  %v281_v2 = vld [vmem:[%s227_s6 + $0x8] sm:$0xff]  ;;  %s1628_s18 = smov 96   ;;  %s1629_s24 = smov 64  }
  0x51   : > { %v280_v1 = vld [vmem:[%s227_s6] sm:$0xff]  ;;  %1302 = vmatprep.subr.msk.mxu0 %vm286_vm0, %v282_v0  ;;  %v285_v4 = vmul.f32 0.17677669, %v281_v2  ;;  %479 = vrot.lane.b32.xlu1 %v282_v0, %s1628_s18  ;;  %s1630_s9 = smov 32   ;;  %vm371_vm1 = vcmask 64512   ;;  %s245_s10 = scalar_lea.vmem [#allocation7], %s1248_s21 }
  0x52   : > { %v284_v3 = vmul.f32 0.17677669, %v280_v1  ;;  %1303 = vmatpush3.xpose.msk.msra.mxu0 %vm286_vm0, %v282_v0  ;;  %v283_v9 = vld [vmem:[%s245_s10] sm:$0xff]  ;;  %vm1081_vm2 = vcmask 523264   ;;  %s277_s11 = scalar_lea.vmem [#allocation8], %s1247_s30  ;;  %vm1084_vm3 = vcmask 785408  }
  0x53   : > { %1307 = vmatprep.subr.mxu1 %v283_v9  ;;  %s1105_s5 = sshll.u32 %s277_s11, 4  ;;  %s1277_s19 = sshll.u32 %s1613_s15, 8  ;;  %s1879_s5 = int_to_ptr.vmem [resolvable:$true] %s1105_s5 }
  0x54   : > { %1304 = vmatprep.mubr.msk.f32.mxu0 %vm286_vm0, %v284_v3  ;;  %1308 = vmatpush3.msra.mxu1 %v283_v9  ;;  %s1885_s1 = scalar_lea.hbm %s1936_s3, %s1277_s19  ;;  %s1090_s15 = scalar_lea.sflag [#allocation4], %s1783_s28 }
  0x55   : > { %1305 = vmatmul.mubr.msk.f32.vlgmr.msra.gmra.mxu0 %vm286_vm0, %v285_v4  ;;  %475 = vrot.lane.b32.xlu1 %v284_v3, %s1628_s18  ;;  %s1537_s2 = scalar_lea.vmem %s1879_s5, 256  ;;  %s1631_s8 = smov [#allocation8]  }
  0x56   : > { %p1538_p8 = scmp.ne.s32.totalorder %s1879_s5, %s1537_s2  ;;  %s1541_s30 = sshll.u32 %s1631_s8, 4  ;;  %s1542_s30 = int_to_ptr.vmem [resolvable:$false] %s1541_s30 }
  0x57   : > { %s1543_s0 = scalar_lea.vmem %s1542_s30, 512  ;;  %p1544_p1 = scmp.lt.s32.totalorder %s1879_s5, %s1542_s30 }
  0x58   : > { %p1539_p12 = pnand %p1538_p8, %p1709_p9  ;;  %p1545_p3 = scmp.lt.s32.totalorder %s1543_s0, %s1537_s2 }
  0x59   : > { %673 = vrot.lane.b32.xlu1 %v282_v0, %s1629_s24 }
  0x5a   : > { %p1540_p0 = pneg %p1539_p12  ;;  %p1546_p2 = por %p1545_p3, %p1544_p1 }
  0x5c   : > { %p1547_p4 = pnand %p1546_p2, %p1540_p0 }
  0x5d   : > { %669 = vrot.lane.b32.xlu1 %v284_v3, %s1629_s24 }
  0x61   : > { %671 = vrot.lane.b32.xlu1 %v285_v4, %s1629_s24 }
  0x65   : > { %866 = vrot.lane.b32.xlu1 %v282_v0, %s1630_s9 }
  0x69   : > { %862 = vrot.lane.b32.xlu1 %v284_v3, %s1630_s9 }
  0x6d   : > { %864 = vrot.lane.b32.xlu1 %v285_v4, %s1630_s9 }
  0x71   : > { %581 = vrot.lane.b32.xlu1 %v283_v9, %s1628_s18 }
  0xc3   : > { %v480_v10 = vpop.permute.xlu1 %479 }
  0xc4   : > { %1312 = vmatprep.subr.msk.mxu1 %vm286_vm0, %v480_v10 }
  0xc7   : > { %v476_v11 = vpop.permute.xlu1 %475 }
  0xcb   : > { %v674_v14 = vpop.permute.xlu1 %673 }
  0xcf   : > { %v670_v19 = vpop.permute.xlu1 %669 }
  0xd3   : > { %v672_v20 = vpop.permute.xlu1 %671 }
  0xd7   : > { %v867_v22 = vpop.permute.xlu1 %866 }
  0xdb   : > { %v863_v25 = vpop.permute.xlu1 %862 }
  0xdf   : > { %v865_v26 = vpop.permute.xlu1 %864 }
  0xe3   : > { %v582_v27 = vpop.permute.xlu1 %581 }
  0xe4   : > { %1317 = vmatprep.subr.mxu0 %v582_v27 }
  0xe5   : > { %1318 = vmatpush3.msra.mxu0 %v582_v27 }
 0x115   : > { %v1306_v5 = vpop.f32.mrf.mxu0 }
 0x116   : > { %v375_v8 = vsel %vm371_vm1, %v1306_v5, -inf }
 0x117   : > { %v362_v6 = vpop.f32.mrf.mxu0 }
 0x118   : > { %v372_v7 = vsel %vm371_vm1, %v362_v6, -inf }
 0x119   : > { %373 = vmax.xlane.f32.xlu0 %v372_v7 }
 0x11d   : > { %376 = vmax.xlane.f32.xlu0 %v375_v8 }
 0x133   : > { %477 = vrot.lane.b32.xlu0 %v285_v4, %s1628_s18 }
 0x1a2   : > { %v374_v12 = vpop.xlane.xlu0 %373 }
 0x1a3   : > { %v378_v13 = vsub.f32 %v362_v6, %v374_v12 }
 0x1a5   : > { %v380_v15 = vmul.f32 1.442695, %v378_v13 }
 0x1a6   : > { %v377_v16 = vpop.xlane.xlu0 %376 }
 0x1a7   : > { %1421 = vpow2.f32 %v380_v15  ;;  %v379_v17 = vsub.f32 %v1306_v5, %v377_v16 }
 0x1a9   : > { %v382_v18 = vmul.f32 1.442695, %v379_v17 }
 0x1aa   : > { %v478_v24 = vpop.permute.xlu0 %477 }
 0x1ab   : > { %1423 = vpow2.f32 %v382_v18 }
 0x1b4   : > { %v1820_v21 = vpop.eup %1421 }
 0x1b5   : > { %1309 = vmatprep.mubr.msk.f32.mxu1 %vm371_vm1, %v1820_v21 }
 0x1b8   : > { %v1824_v23 = vpop.eup %1423 }
 0x1b9   : > { %1310 = vmatmul.mubr.msk.f32.vlgmr.msra.gmra.mxu1 %vm371_vm1, %v1824_v23 }
 0x1ba   : > { %1313 = vmatpush3.xpose.msk.msra.mxu1 %vm286_vm0, %v480_v10  ;;  %1314 = vmatprep.mubr.msk.f32.mxu1 %vm286_vm0, %v476_v11  ;;  %v387_v10 = vsel %vm371_vm1, %v1824_v23, 0.0  ;;  %v384_v11 = vsel %vm371_vm1, %v1820_v21, 0.0 }
 0x1bb   : > { %1322 = vmatprep.subr.msk.mxu1 %vm286_vm0, %v674_v14 }
 0x1bd   : > { %1315 = vmatmul.mubr.msk.f32.vlgmr.msra.gmra.mxu1 %vm286_vm0, %v478_v24 }
 0x1be   : > { %1323 = vmatpush3.xpose.msk.msra.mxu1 %vm286_vm0, %v674_v14  ;;  %1324 = vmatprep.mubr.msk.f32.mxu1 %vm286_vm0, %v670_v19 }
 0x1bf   : > { %1332 = vmatprep.subr.msk.mxu1 %vm286_vm0, %v867_v22 }
 0x1c1   : > { %1325 = vmatmul.mubr.msk.f32.vlgmr.msra.gmra.mxu1 %vm286_vm0, %v672_v20 }
 0x1c2   : > { %1333 = vmatpush3.xpose.msk.msra.mxu1 %vm286_vm0, %v867_v22  ;;  %1334 = vmatprep.mubr.msk.f32.mxu1 %vm286_vm0, %v863_v25 }
 0x1c5   : > { %1335 = vmatmul.mubr.msk.f32.vlgmr.msra.gmra.mxu1 %vm286_vm0, %v865_v26 }
 0x279   : > { %v1839_v28 = vpop.f32.mrf.mxu1 }
 0x27b   : > { %v1841_v29 = vpop.f32.mrf.mxu1 }
 0x27d   : > { %v1316_v30 = vpop.f32.mrf.mxu1 }
 0x27e   : > { %v565_v31 = vsel %vm371_vm1, %v1316_v30, -inf }
 0x27f   : > { %566 = vmax.xlane.f32.xlu1 %v565_v31  ;;  %v553_v32 = vpop.f32.mrf.mxu1 }
 0x280   : > { %v562_v33 = vsel %vm371_vm1, %v553_v32, -inf }
 0x281   : > { %v1326_v34 = vpop.f32.mrf.mxu1  ;;  %563 = vmax.xlane.f32.xlu0 %v562_v33 }
 0x282   : > { %v759_v36 = vsel %vm371_vm1, %v1326_v34, -inf }
 0x283   : > { %v747_v35 = vpop.f32.mrf.mxu1 }
 0x284   : > { %v756_v40 = vsel %vm371_vm1, %v747_v35, -inf }
 0x285   : > { %v1336_v37 = vpop.f32.mrf.mxu1  ;;  %760 = vmax.xlane.f32.xlu0 %v759_v36 }
 0x286   : > { %v952_v41 = vsel %vm371_vm1, %v1336_v37, -inf }
 0x287   : > { %v940_v38 = vpop.f32.mrf.mxu1 }
 0x288   : > { %v949_v39 = vsel %vm371_vm1, %v940_v38, -inf }
 0x289   : > { %950 = vmax.xlane.f32.xlu1 %v949_v39  ;;  %757 = vmax.xlane.f32.xlu0 %v756_v40 }
 0x28d   : > { %953 = vmax.xlane.f32.xlu0 %v952_v41 }
 0x29a   : > { %967 = vrot.lane.b32.xlu1 %v283_v9, %s1630_s9 }
 0x2a3   : > { %774 = vrot.lane.b32.xlu0 %v283_v9, %s1629_s24 }
 0x308   : > { %v567_v42 = vpop.xlane.xlu1 %566 }
 0x309   : > { %v569_v43 = vsub.f32 %v1316_v30, %v567_v42 }
 0x30a   : > { %v564_v44 = vpop.xlane.xlu0 %563 }
 0x30b   : > { %v572_v45 = vmul.f32 1.442695, %v569_v43  ;;  %v568_v46 = vsub.f32 %v553_v32, %v564_v44 }
 0x30d   : > { %1425 = vpow2.f32 %v572_v45  ;;  %v570_v47 = vmul.f32 1.442695, %v568_v46 }
 0x30e   : > { %v761_v48 = vpop.xlane.xlu0 %760 }
 0x30f   : > { %1427 = vpow2.f32 %v570_v47  ;;  %v763_v49 = vsub.f32 %v1326_v34, %v761_v48 }
 0x311   : > { %v766_v50 = vmul.f32 1.442695, %v763_v49 }
 0x312   : > { %v951_v51 = vpop.xlane.xlu1 %950  ;;  %v758_v52 = vpop.xlane.xlu0 %757 }
 0x313   : > { %1429 = vpow2.f32 %v766_v50  ;;  %v955_v53 = vsub.f32 %v940_v38, %v951_v51  ;;  %v762_v54 = vsub.f32 %v747_v35, %v758_v52 }
 0x315   : > { %v764_v55 = vmul.f32 1.442695, %v762_v54  ;;  %v957_v56 = vmul.f32 1.442695, %v955_v53 }
 0x316   : > { %v954_v57 = vpop.xlane.xlu0 %953  ;;  %v968_v1 = vpop.permute.xlu1 %967 }
 0x317   : > { %v956_v58 = vsub.f32 %v1336_v37, %v954_v57  ;;  %1431 = vpow2.f32 %v764_v55 }
 0x318   : > { %1433 = vpow2.f32 %v957_v56 }
 0x319   : > { %v959_v59 = vmul.f32 1.442695, %v956_v58 }
 0x31a   : > { %v1426_v60 = vpop.eup %1425  ;;  %v775_v61 = vpop.permute.xlu0 %774 }
 0x31b   : > { %1435 = vpow2.f32 %v959_v59  ;;  %v577_v62 = vsel %vm371_vm1, %v1426_v60, 0.0  ;;  %1327 = vmatprep.subr.mxu0 %v775_v61 }
 0x31c   : > { %v1428_v63 = vpop.eup %1427  ;;  %578 = vadd.xlane.f32.xlu0 %v577_v62 }
 0x31d   : > { %1319 = vmatprep.mubr.msk.f32.mxu0 %vm371_vm1, %v1428_v63  ;;  %v574_v0 = vsel %vm371_vm1, %v1428_v63, 0.0 }
 0x31e   : > { %1320 = vmatmul.mubr.msk.f32.vlgmr.msra.gmra.mxu0 %vm371_vm1, %v1426_v60  ;;  %575 = vadd.xlane.f32.xlu1 %v574_v0 }
 0x31f   : > { %1328 = vmatpush3.msra.mxu0 %v775_v61 }
 0x320   : > { %v1430_v2 = vpop.eup %1429  ;;  %1337 = vmatprep.subr.mxu0 %v968_v1 }
 0x321   : > { %v771_v3 = vsel %vm371_vm1, %v1430_v2, 0.0 }
 0x322   : > { %772 = vadd.xlane.f32.xlu1 %v771_v3 }
 0x324   : > { %v1432_v4 = vpop.eup %1431 }
 0x325   : > { %1329 = vmatprep.mubr.msk.f32.mxu0 %vm371_vm1, %v1432_v4  ;;  %v768_v5 = vsel %vm371_vm1, %v1432_v4, 0.0  ;;  %v1434_v6 = vpop.eup %1433 }
 0x326   : > { %769 = vadd.xlane.f32.xlu0 %v768_v5  ;;  %1330 = vmatmul.mubr.msk.f32.vlgmr.msra.gmra.mxu0 %vm371_vm1, %v1430_v2  ;;  %v961_v9 = vsel %vm371_vm1, %v1434_v6, 0.0 }
 0x327   : > { %1338 = vmatpush3.msra.mxu0 %v968_v1  ;;  %1339 = vmatprep.mubr.msk.f32.mxu0 %vm371_vm1, %v1434_v6 }
 0x328   : > { %v1436_v7 = vpop.eup %1435 }
 0x329   : > { %v964_v8 = vsel %vm371_vm1, %v1436_v7, 0.0 }
 0x32a   : > { %965 = vadd.xlane.f32.xlu1 %v964_v8  ;;  %962 = vadd.xlane.f32.xlu0 %v961_v9 }
 0x32b   : > { %1340 = vmatmul.mubr.msk.f32.vlgmr.msra.gmra.mxu0 %vm371_vm1, %v1436_v7 }
 0x32e   : > { %388 = vadd.xlane.f32.xlu1 %v387_v10  ;;  %385 = vadd.xlane.f32.xlu0 %v384_v11 }
 0x3a5   : > { %v579_v12 = vpop.xlane.xlu0 %578 }
 0x3a6   : > { %1437 = vrcp.f32 %v579_v12 }
 0x3a7   : > { %v576_v13 = vpop.xlane.xlu1 %575 }
 0x3a8   : > { %1439 = vrcp.f32 %v576_v13 }
 0x3ab   : > { %v773_v14 = vpop.xlane.xlu1 %772 }
 0x3ac   : > { %1441 = vrcp.f32 %v773_v14 }
 0x3af   : > { %v770_v15 = vpop.xlane.xlu0 %769 }
 0x3b0   : > { %1443 = vrcp.f32 %v770_v15 }
 0x3b3   : > { %v966_v16 = vpop.xlane.xlu1 %965  ;;  %v963_v17 = vpop.xlane.xlu0 %962 }
 0x3b4   : > { %v1438_v18 = vpop.eup %1437  ;;  %1445 = vrcp.f32 %v966_v16 }
 0x3b5   : > { %v1440_v22 = vpop.eup %1439  ;;  %1447 = vrcp.f32 %v963_v17 }
 0x3b7   : > { %v389_v38 = vpop.xlane.xlu1 %388  ;;  %v386_v39 = vpop.xlane.xlu0 %385 }
 0x3b8   : > { %1449 = vrcp.f32 %v389_v38 }
 0x3b9   : > { %v1442_v24 = vpop.eup %1441  ;;  %1451 = vrcp.f32 %v386_v39 }
 0x3bd   : > { %v1444_v27 = vpop.eup %1443 }
 0x3c1   : > { %v1446_v32 = vpop.eup %1445 }
 0x3c2   : > { %v1448_v35 = vpop.eup %1447 }
 0x3c5   : > { %v1450_v41 = vpop.eup %1449 }
 0x3c6   : > { %v1452_v43 = vpop.eup %1451  ;;  %v474_v45 = vmul.f32 %v1450_v41, %v1839_v28 }
 0x3c7   : > { %v473_v48 = vmul.f32 %v1452_v43, %v1841_v29 }
 0x3de   : > { %v1321_v19 = vpop.f32.mrf.mxu0 }
 0x3df   : > { %v668_v20 = vmul.f32 %v1438_v18, %v1321_v19 }
 0x3e0   : > { %v656_v23 = vpop.f32.mrf.mxu0 }
 0x3e1   : > { %v667_v21 = vmul.f32 %v1440_v22, %v656_v23  ;;  %1059 = vrot.lane.b32.xlu1 %v668_v20, %s1630_s9 }
 0x3e3   : > { %1057 = vrot.lane.b32.xlu0 %v667_v21, %s1630_s9 }
 0x3e6   : > { %v1331_v25 = vpop.f32.mrf.mxu0 }
 0x3e7   : > { %v861_v26 = vmul.f32 %v1442_v24, %v1331_v25 }
 0x3e8   : > { %v849_v30 = vpop.f32.mrf.mxu0 }
 0x3e9   : > { %v860_v31 = vmul.f32 %v1444_v27, %v849_v30  ;;  %1067 = vrot.lane.b32.xlu0 %v861_v26, %s1629_s24 }
 0x3eb   : > { %v1341_v33 = vpop.f32.mrf.mxu0  ;;  %1065 = vrot.lane.b32.xlu1 %v860_v31, %s1629_s24 }
 0x3ec   : > { %v1054_v34 = vmul.f32 %v1446_v32, %v1341_v33 }
 0x3ed   : > { %v1042_v36 = vpop.f32.mrf.mxu0 }
 0x3ee   : > { %v1053_v37 = vmul.f32 %v1448_v35, %v1042_v36  ;;  %1075 = vrot.lane.b32.xlu0 %v1054_v34, %s1628_s18 }
 0x3f0   : > { %1073 = vrot.lane.b32.xlu1 %v1053_v37, %s1628_s18 }
 0x453   : > { %v1060_v42 = vpop.permute.xlu1 %1059 }
 0x454   : > { %v1080_v47 = vsel %vm286_vm0, %v474_v45, %v1060_v42 }
 0x455   : > { %v1058_v40 = vpop.permute.xlu0 %1057 }
 0x456   : > { %v1079_v28 = vsel %vm286_vm0, %v473_v48, %v1058_v40 }
 0x45b   : > { %v1068_v44 = vpop.permute.xlu0 %1067 }
 0x45c   : > { %v1083_v49 = vsel %vm1081_vm2, %v1080_v47, %v1068_v44 }
 0x45d   : > { %v1066_v46 = vpop.permute.xlu1 %1065 }
 0x45e   : > { %v1082_v52 = vsel %vm1081_vm2, %v1079_v28, %v1066_v46 }
 0x460   : > { %v1076_v50 = vpop.permute.xlu0 %1075 }
 0x461   : > { %v1086_v51 = vsel %vm1084_vm3, %v1083_v49, %v1076_v50 }
 0x462   : > { %1088 = vst [vmem:[%s277_s11 + $0x8] sm:$0xff] %v1086_v51  ;;  %v1074_v53 = vpop.permute.xlu1 %1073 }
 0x463   : > { %v1085_v54 = vsel %vm1084_vm3, %v1082_v52, %v1074_v53 }
 0x464   : > { %1087 = vst [vmem:[%s277_s11] sm:$0xff] %v1085_v54 }
 0x465   : > { %1550 = shalt.err (!%p1547_p4)
}
 0x466   : > { %s1551_s6 = scalar_lea.hbm %s1885_s1, 256  ;;  %s1555_s22 = scalar_lea.hbm %s1936_s3, 512 }
 0x467   : > { %p1552_p5 = scmp.ne.s32.totalorder %s1885_s1, %s1551_s6  ;;  %p1556_p10 = scmp.lt.s32.totalorder %s1885_s1, %s1936_s3 }
 0x468   : > { %p1557_p13 = scmp.lt.s32.totalorder %s1555_s22, %s1551_s6 }
 0x469   : > { %p1553_p6 = pnand %p1552_p5, %p1709_p9 }
 0x46a   : > { %p1558_p8 = por %p1557_p13, %p1556_p10 }
 0x46b   : > { %p1554_p7 = pneg %p1553_p6 }
 0x46d   : > { %p1559_p12 = pnand %p1558_p8, %p1554_p7 }
 0x46f   : > { %1562 = shalt.err (!%p1559_p12)
}
 0x470   : > { %s1632_s24 = smov 128   ;;  %s1633_s9 = smov 8  }
 0x471   : > { %1348 = dma.vmem_to_hbm [thread:$0]  (%p1709_p9), %s1879_s5, 256, %s1885_s1, %s1090_s15, %s1632_s24, %s1632_s24, %s1633_s9  }
 0x472 PF: > { %s1120_s10 = sand.u32 1, %s1601_s12   ;;  %p1951_p0 = scmp.ge.s32.totalorder %s1621_s17, 2 }
 0x473   : > { %s1121_s11 = scalar_lea.sflag [#allocation4], %s1120_s10 }
 0x474   : > { %p1361_p1 = pnand %p1951_p0, %p1716_p11 }
 0x476   : > { %p1362_p3 = pneg %p1361_p1 }
 0x478   : > { %1596 = dma.done.wait (%p1362_p3), %s1121_s11, 256  }
 0x479   : > { %1598 = vsyncadd (%p1362_p3), %s1121_s11, 4294967040  ;;  %s22_s17 = sadd.s32 1, %s1621_s17   ;;  %s1952_s12 = smov %s1605_s13 }
 0x47a   : > { %p19_p2 = scmp.ge.s32.totalorder %s22_s17, 4   ;;  %s1953_s13 = smov %s1609_s14 }
 0x47b   : > { %s1954_s14 = smov %s1714_s26  ;;  %s1955_s15 = smov %s1617_s16 }
 0x47c   : > { %s1956_s16 = smov %s1958_s20  ;;  %21 = sbr.rel (!%p19_p2) target bundleno = 12 (0xc), region = 101 }
 0x481   :  { %1126 = vsyncpa [#allocation3], 1 }
 0x482   :  { %1128 = vsyncpa [#allocation3 + $0x1], 1 }
 0x483   :  { %1129 = vsyncpa [#allocation6], 1 }
 0x484   :  { %1131 = vsyncpa [#allocation6 + $0x1], 1 }
 0x485   :  { %1132 = vsyncpa [#allocation4], 1 }
 0x486   :  { %1134 = vsyncpa [#allocation4 + $0x1], 1 }

</bundles_post_ra>
